<compile_context>
chip_gen: v6e
topology: v6e:2x2x1
jax: 0.10.0
libtpu: 0.0.40
codegen_flags: <defaults>
</compile_context>

<pallas_src>
import jax
import jax.numpy as jnp
from jax.experimental import pallas as pl
from jax.experimental.pallas import tpu as pltpu


def _round_up(a, m):
    return ((a + m - 1) // m) * m


def _mlp_add_kernel(pos_ref, x_ref, w1_ref, b1_ref, w2_ref, b2_ref,
                    w3_ref, b3_ref, o_ref):
    # x tile: (tm, pack*d); weights fully resident in VMEM (they are tiny).
    # All dots accumulate in f32; biases / ReLU / residual add stay f32.
    x = x_ref[...]
    h = jnp.dot(x, w1_ref[...], preferred_element_type=jnp.float32) + b1_ref[...]
    h = jnp.maximum(h, 0.0)
    h = jnp.dot(h.astype(w2_ref.dtype), w2_ref[...],
                preferred_element_type=jnp.float32) + b2_ref[...]
    h = jnp.maximum(h, 0.0)
    h = jnp.dot(h.astype(w3_ref.dtype), w3_ref[...],
                preferred_element_type=jnp.float32) + b3_ref[...]
    h = jnp.maximum(h, 0.0)
    o_ref[...] = (pos_ref[...] + h).astype(o_ref.dtype)


def downsample_forward(pos, x, params, *, tm=512, compute_dtype=jnp.float32):
    """pos: (B, N, 2) f32;  x: (B, N, d) f32  ->  (B, N, 2) f32.

    tm is the row tile in *packed* rows (each packed row holds `pack` tokens,
    pack = max(1, 128 // d)).  tm=512 => 2048 tokens per grid step for d=32.
    """
    B, N, d = x.shape
    w1, b1, w2, b2, w3, b3 = params
    ho = w3.shape[1]
    M = B * N

    # ---- token packing: put `pack` tokens side-by-side along the lane axis ----
    pack = max(1, 128 // d)
    if pack > 1:
        eye = jnp.eye(pack, dtype=w1.dtype)
        # Block-diagonal weight replication: kron(I_pack, W).
        w1p, w2p, w3p = jnp.kron(eye, w1), jnp.kron(eye, w2), jnp.kron(eye, w3)
        b1p, b2p, b3p = (jnp.tile(b1, (1, pack)), jnp.tile(b2, (1, pack)),
                         jnp.tile(b3, (1, pack)))
    else:
        w1p, b1p, w2p, b2p, w3p, b3p = w1, b1, w2, b2, w3, b3

    # Weights / activations may be bf16; biases stay f32 (post-accumulation add).
    w1p = w1p.astype(compute_dtype)
    w2p = w2p.astype(compute_dtype)
    w3p = w3p.astype(compute_dtype)

    # ---- tile / padding arithmetic (no divisibility assert) ----
    rows = pl.cdiv(M, pack)                                # packed rows needed
    tm_eff = _round_up(min(tm, _round_up(rows, 8)), 8)     # don't over-tile tiny M
    rows_pad = _round_up(rows, tm_eff)
    M_pad = rows_pad * pack
    grid = rows_pad // tm_eff

    pos2 = pos.reshape(M, ho).astype(jnp.float32)
    x2 = x.reshape(M, d).astype(compute_dtype)
    if M_pad > M:
        pos2 = jnp.pad(pos2, ((0, M_pad - M), (0, 0)))
        x2 = jnp.pad(x2, ((0, M_pad - M), (0, 0)))
    posp = pos2.reshape(rows_pad, pack * ho)               # contiguous re-view
    xp = x2.reshape(rows_pad, pack * d)

    # ---- advisory cost estimate (mem-bound kernel) ----
    itemsize = jnp.dtype(compute_dtype).itemsize
    flops = 2 * rows_pad * (xp.shape[1] * w1p.shape[1]
                            + w1p.shape[1] * w2p.shape[1]
                            + w2p.shape[1] * w3p.shape[1])
    bytes_accessed = (xp.size * itemsize + 2 * posp.size * 4
                      + (w1p.size + w2p.size + w3p.size) * itemsize
                      + (b1p.size + b2p.size + b3p.size) * 4)
    ce = pl.CostEstimate(flops=int(flops), transcendentals=0,
                         bytes_accessed=int(bytes_accessed))

    row = lambda i: (i, 0)
    full = lambda i: (0, 0)

    out = pl.pallas_call(
        _mlp_add_kernel,
        out_shape=jax.ShapeDtypeStruct((rows_pad, pack * ho), jnp.float32),
        grid_spec=pltpu.PrefetchScalarGridSpec(
            num_scalar_prefetch=0,
            grid=(grid,),
            in_specs=[
                pl.BlockSpec((tm_eff, pack * ho), row),   # pos (packed)
                pl.BlockSpec((tm_eff, pack * d), row),    # x   (packed, lane-dense)
                pl.BlockSpec(w1p.shape, full),            # W1 block-diag
                pl.BlockSpec(b1p.shape, full),            # b1 tiled
                pl.BlockSpec(w2p.shape, full),            # W2 block-diag
                pl.BlockSpec(b2p.shape, full),            # b2 tiled
                pl.BlockSpec(w3p.shape, full),            # W3 block-diag
                pl.BlockSpec(b3p.shape, full),            # b3 tiled
            ],
            out_specs=pl.BlockSpec((tm_eff, pack * ho), row),
        ),
        compiler_params=pltpu.CompilerParams(
            dimension_semantics=("parallel",)),
        cost_estimate=ce,
    )(posp, xp, w1p, b1p, w2p, b2p, w3p, b3p)

    out = out.reshape(M_pad, ho)[:M]
    return out.reshape(B, N, ho)


def init_params(key, feature_dim):
    """Deterministic synthetic weights matching the nn.Linear shapes."""
    d = feature_dim
    dims = [(d, d // 2), (d // 2, d // 4), (d // 4, 2)]
    params = []
    keys = jax.random.split(key, 2 * len(dims))
    for i, (fin, fout) in enumerate(dims):
        bound = 1.0 / (fin ** 0.5)
        w = jax.random.uniform(keys[2 * i], (fin, fout), jnp.float32, -bound, bound)
        b = jax.random.uniform(keys[2 * i + 1], (1, fout), jnp.float32, -bound, bound)
        params += [w, b]
    return tuple(params)


def reference_forward(pos, x, params):
    w1, b1, w2, b2, w3, b3 = params
    h = jax.nn.relu(x @ w1 + b1[0])
    h = jax.nn.relu(h @ w2 + b2[0])
    h = jax.nn.relu(h @ w3 + b3[0])
    return pos + h


if __name__ == "__main__":
    B, N, d = 2, 8, 32  # feature_dim = 32  ->  MLP: 32 -> 16 -> 8 -> 2
    key = jax.random.PRNGKey(0)
    kpos, kx, kp = jax.random.split(key, 3)

    pos = jax.random.normal(kpos, (B, N, 2), jnp.float32)
    x = jax.random.normal(kx, (B, N, d), jnp.float32)
    params = init_params(kp, d)

    out = jax.block_until_ready(downsample_forward(pos, x, params))
    ref = reference_forward(pos, x, params)
    assert out.shape == (B, N, 2)
    assert jnp.allclose(out, ref, atol=1e-4, rtol=1e-4)

    # Exercise the multi-tile grid + row-padding path (M not a tile multiple).
    B2, N2 = 2, 200
    pos_b = jax.random.normal(jax.random.PRNGKey(1), (B2, N2, 2), jnp.float32)
    x_b = jax.random.normal(jax.random.PRNGKey(2), (B2, N2, d), jnp.float32)
    out_b = jax.block_until_ready(downsample_forward(pos_b, x_b, params, tm=16))
    ref_b = reference_forward(pos_b, x_b, params)
    assert jnp.allclose(out_b, ref_b, atol=1e-4, rtol=1e-4)

    # bf16 inputs/weights (f32 accumulation) — halves dominant HBM read traffic.
    out_bf16 = jax.block_until_ready(
        downsample_forward(pos_b, x_b, params, tm=16, compute_dtype=jnp.bfloat16))
    assert float(jnp.max(jnp.abs(out_bf16 - ref_b))) < 0.1

    print("KERNEL_OK")
</pallas_src>

<mosaic_0001>
module attributes {stable_mosaic.version = 11 : i64} {
  func.func @_mlp_add_kernel(%arg0: i32, %arg1: memref<8x8xf32, #tpu.memory_space<vmem>>, %arg2: memref<8x128xf32, #tpu.memory_space<vmem>>, %arg3: memref<128x64xf32, #tpu.memory_space<vmem>>, %arg4: memref<1x64xf32, #tpu.memory_space<vmem>>, %arg5: memref<64x32xf32, #tpu.memory_space<vmem>>, %arg6: memref<1x32xf32, #tpu.memory_space<vmem>>, %arg7: memref<32x8xf32, #tpu.memory_space<vmem>>, %arg8: memref<1x8xf32, #tpu.memory_space<vmem>>, %arg9: memref<8x8xf32, #tpu.memory_space<vmem>>) attributes {dimension_semantics = [#tpu.dimension_semantics<parallel>], iteration_bounds = array<i64: 1>, scalar_prefetch = 0 : i64, scratch_operands = 0 : i64, tpu.core_type = #tpu.core_type<tc>, window_params = [{transform_indices = @transform_0, window_bounds = array<i64: 8, 8>}, {transform_indices = @transform_1, window_bounds = array<i64: 8, 128>}, {pipeline_mode = #tpu.pipeline_mode<synchronous>, transform_indices = @transform_2, window_bounds = array<i64: 128, 64>}, {pipeline_mode = #tpu.pipeline_mode<synchronous>, transform_indices = @transform_3, window_bounds = array<i64: 1, 64>}, {pipeline_mode = #tpu.pipeline_mode<synchronous>, transform_indices = @transform_4, window_bounds = array<i64: 64, 32>}, {pipeline_mode = #tpu.pipeline_mode<synchronous>, transform_indices = @transform_5, window_bounds = array<i64: 1, 32>}, {pipeline_mode = #tpu.pipeline_mode<synchronous>, transform_indices = @transform_6, window_bounds = array<i64: 32, 8>}, {pipeline_mode = #tpu.pipeline_mode<synchronous>, transform_indices = @transform_7, window_bounds = array<i64: 1, 8>}, {transform_indices = @transform_8, window_bounds = array<i64: 8, 8>}]} {
    %c0 = arith.constant 0 : index
    %c0_0 = arith.constant 0 : index
    %0 = vector.load %arg2[%c0, %c0_0] : memref<8x128xf32, #tpu.memory_space<vmem>>, vector<8x128xf32>
    %c0_1 = arith.constant 0 : index
    %c0_2 = arith.constant 0 : index
    %1 = vector.load %arg3[%c0_1, %c0_2] : memref<128x64xf32, #tpu.memory_space<vmem>>, vector<128x64xf32>
    %cst = arith.constant dense<0.000000e+00> : vector<8x64xf32>
    %2 = tpu.matmul %0, %1, %cst {dimension_numbers = #tpu.dot_dimension_numbers<[1], [0], [0], [1], [0, 0, 1, 1], [], []>} : vector<8x128xf32>, vector<128x64xf32>, vector<8x64xf32> -> vector<8x64xf32>
    %c0_3 = arith.constant 0 : index
    %c0_4 = arith.constant 0 : index
    %3 = vector.load %arg4[%c0_3, %c0_4] : memref<1x64xf32, #tpu.memory_space<vmem>>, vector<1x64xf32>
    %4 = vector.broadcast %3 : vector<1x64xf32> to vector<8x64xf32>
    %5 = arith.addf %2, %4 : vector<8x64xf32>
    %cst_5 = arith.constant 0.000000e+00 : f32
    %6 = vector.broadcast %cst_5 : f32 to vector<8x64xf32>
    %7 = arith.maximumf %5, %6 : vector<8x64xf32>
    %c0_6 = arith.constant 0 : index
    %c0_7 = arith.constant 0 : index
    %8 = vector.load %arg5[%c0_6, %c0_7] : memref<64x32xf32, #tpu.memory_space<vmem>>, vector<64x32xf32>
    %cst_8 = arith.constant dense<0.000000e+00> : vector<8x32xf32>
    %9 = tpu.matmul %7, %8, %cst_8 {dimension_numbers = #tpu.dot_dimension_numbers<[1], [0], [0], [1], [0, 0, 1, 1], [], []>} : vector<8x64xf32>, vector<64x32xf32>, vector<8x32xf32> -> vector<8x32xf32>
    %c0_9 = arith.constant 0 : index
    %c0_10 = arith.constant 0 : index
    %10 = vector.load %arg6[%c0_9, %c0_10] : memref<1x32xf32, #tpu.memory_space<vmem>>, vector<1x32xf32>
    %11 = vector.broadcast %10 : vector<1x32xf32> to vector<8x32xf32>
    %12 = arith.addf %9, %11 : vector<8x32xf32>
    %cst_11 = arith.constant 0.000000e+00 : f32
    %13 = vector.broadcast %cst_11 : f32 to vector<8x32xf32>
    %14 = arith.maximumf %12, %13 : vector<8x32xf32>
    %c0_12 = arith.constant 0 : index
    %c0_13 = arith.constant 0 : index
    %15 = vector.load %arg7[%c0_12, %c0_13] : memref<32x8xf32, #tpu.memory_space<vmem>>, vector<32x8xf32>
    %cst_14 = arith.constant dense<0.000000e+00> : vector<8x8xf32>
    %16 = tpu.matmul %14, %15, %cst_14 {dimension_numbers = #tpu.dot_dimension_numbers<[1], [0], [0], [1], [0, 0, 1, 1], [], []>} : vector<8x32xf32>, vector<32x8xf32>, vector<8x8xf32> -> vector<8x8xf32>
    %c0_15 = arith.constant 0 : index
    %c0_16 = arith.constant 0 : index
    %17 = vector.load %arg8[%c0_15, %c0_16] : memref<1x8xf32, #tpu.memory_space<vmem>>, vector<1x8xf32>
    %18 = vector.broadcast %17 : vector<1x8xf32> to vector<8x8xf32>
    %19 = arith.addf %16, %18 : vector<8x8xf32>
    %cst_17 = arith.constant 0.000000e+00 : f32
    %20 = vector.broadcast %cst_17 : f32 to vector<8x8xf32>
    %21 = arith.maximumf %19, %20 : vector<8x8xf32>
    %c0_18 = arith.constant 0 : index
    %c0_19 = arith.constant 0 : index
    %22 = vector.load %arg1[%c0_18, %c0_19] : memref<8x8xf32, #tpu.memory_space<vmem>>, vector<8x8xf32>
    %23 = arith.addf %22, %21 : vector<8x8xf32>
    %c0_20 = arith.constant 0 : index
    %c0_21 = arith.constant 0 : index
    %24 = vector.load %arg9[%c0_20, %c0_21] : memref<8x8xf32, #tpu.memory_space<vmem>>, vector<8x8xf32>
    tpu.vector_store %arg9[%c0_20, %c0_21], %23 {strides = array<i32>} : memref<8x8xf32, #tpu.memory_space<vmem>>, vector<8x8xf32>,
    return
  }
  func.func @transform_0(%arg0: i32) -> (i32, i32) {
    %c0_i32 = arith.constant 0 : i32
    %c0_i32_0 = arith.constant 0 : i32
    return %arg0, %c0_i32 : i32, i32
  }
  func.func @transform_1(%arg0: i32) -> (i32, i32) {
    %c0_i32 = arith.constant 0 : i32
    %c0_i32_0 = arith.constant 0 : i32
    return %arg0, %c0_i32 : i32, i32
  }
  func.func @transform_2(%arg0: i32) -> (i32, i32) {
    %c0_i32 = arith.constant 0 : i32
    %c0_i32_0 = arith.constant 0 : i32
    %c0_i32_1 = arith.constant 0 : i32
    return %c0_i32, %c0_i32_0 : i32, i32
  }
  func.func @transform_3(%arg0: i32) -> (i32, i32) {
    %c0_i32 = arith.constant 0 : i32
    %c0_i32_0 = arith.constant 0 : i32
    %c0_i32_1 = arith.constant 0 : i32
    return %c0_i32, %c0_i32_0 : i32, i32
  }
  func.func @transform_4(%arg0: i32) -> (i32, i32) {
    %c0_i32 = arith.constant 0 : i32
    %c0_i32_0 = arith.constant 0 : i32
    %c0_i32_1 = arith.constant 0 : i32
    return %c0_i32, %c0_i32_0 : i32, i32
  }
  func.func @transform_5(%arg0: i32) -> (i32, i32) {
    %c0_i32 = arith.constant 0 : i32
    %c0_i32_0 = arith.constant 0 : i32
    %c0_i32_1 = arith.constant 0 : i32
    return %c0_i32, %c0_i32_0 : i32, i32
  }
  func.func @transform_6(%arg0: i32) -> (i32, i32) {
    %c0_i32 = arith.constant 0 : i32
    %c0_i32_0 = arith.constant 0 : i32
    %c0_i32_1 = arith.constant 0 : i32
    return %c0_i32, %c0_i32_0 : i32, i32
  }
  func.func @transform_7(%arg0: i32) -> (i32, i32) {
    %c0_i32 = arith.constant 0 : i32
    %c0_i32_0 = arith.constant 0 : i32
    %c0_i32_1 = arith.constant 0 : i32
    return %c0_i32, %c0_i32_0 : i32, i32
  }
  func.func @transform_8(%arg0: i32) -> (i32, i32) {
    %c0_i32 = arith.constant 0 : i32
    %c0_i32_0 = arith.constant 0 : i32
    return %arg0, %c0_i32 : i32, i32
  }
}

</mosaic_0001>

<bundles_post_ra>
// kernel: tpu_custom_call.1
= control target key start
LH: loop header
LB: loop body
LE: loop exit
PB: predicated region body
PF: predicated region fallthrough
CT: control target
= control target key end

     0   :  { %v445_v1 = vmov 0.0   ;;  %vm446_vm0 = vmmov 0   ;;  %s629_s0 = inlined_call_operand.vmem [shape: f32[8,8], index: 0, kind: input, shape index: {}]   ;;  %s630_s1 = inlined_call_operand.vmem [shape: f32[8,128], index: 1, kind: input, shape index: {}]   ;;  %s631_s2 = inlined_call_operand.vmem [shape: f32[128,64], index: 2, kind: input, shape index: {}]   ;;  %s632_s3 = inlined_call_operand.vmem [shape: f32[1,64], index: 3, kind: input, shape index: {}]   ;;  %s633_s4 = inlined_call_operand.vmem [shape: f32[64,32], index: 4, kind: input, shape index: {}]   ;;  %s634_s5 = inlined_call_operand.vmem [shape: f32[1,32], index: 5, kind: input, shape index: {}]   ;;  %s635_s6 = inlined_call_operand.vmem [shape: f32[32,8], index: 6, kind: input, shape index: {}]   ;;  %s636_s7 = inlined_call_operand.vmem [shape: f32[1,8], index: 7, kind: input, shape index: {}]   ;;  %s637_s8 = inlined_call_operand.hbm [shape: f32[8,8], index: 8, kind: output, shape index: {}]  }
   0x1   :  { %v46_v0 = vld [vmem:[%s631_s2 + $0x78] sm:$0xff]  ;;  %355 = vmatprep.subr.mxu0 %v445_v1  ;;  %v45_v2 = vld [vmem:[%s631_s2 + $0x70] sm:$0xff]  ;;  %387 = vmatprep.mubr.msk.f32.mxu0 %vm446_vm0, %v445_v1  ;;  %v44_v3 = vld [vmem:[%s631_s2 + $0x68] sm:$0xff] }
   0x2   :  { %356 = vmatpush3.msra.mxu0 %v46_v0  ;;  %390 = vmatprep.subr.mxu1 %v445_v1  ;;  %v43_v4 = vld [vmem:[%s631_s2 + $0x60] sm:$0xff]  ;;  %v132_v5 = vld [vmem:[%s633_s4 + $0x38] sm:$0xff]  ;;  %v131_v6 = vld [vmem:[%s633_s4 + $0x30] sm:$0xff] }
   0x3   :  { %357 = vmatprep.subr.mxu0 %v445_v1  ;;  %406 = vmatprep.mubr.msk.f32.mxu1 %vm446_vm0, %v445_v1  ;;  %v42_v7 = vld [vmem:[%s631_s2 + $0x58] sm:$0xff]  ;;  %v130_v8 = vld [vmem:[%s633_s4 + $0x28] sm:$0xff] }
   0x4   :  { %358 = vmatpush3.msra.mxu0 %v45_v2  ;;  %391 = vmatpush3.msra.mxu1 %v132_v5 }
   0x5   :  { %359 = vmatprep.subr.mxu0 %v445_v1  ;;  %392 = vmatprep.subr.mxu1 %v445_v1 }
   0x6   :  { %360 = vmatpush3.msra.mxu0 %v44_v3 }
   0x7   :  { %361 = vmatprep.subr.mxu0 %v445_v1 }
   0x8   :  { %13 = vsyncpa [#allocation3], 0  ;;  %362 = vmatpush3.msra.mxu0 %v43_v4  ;;  %393 = vmatpush3.msra.mxu1 %v131_v6  ;;  %v41_v9 = vld [vmem:[%s631_s2 + $0x50] sm:$0xff]  ;;  %v129_v10 = vld [vmem:[%s633_s4 + $0x20] sm:$0xff]  ;;  %vm140_vm1 = vcmask 523264   ;;  %vm226_vm2 = vcmask 261120  }
   0x9   :  { %363 = vmatprep.subr.mxu0 %v445_v1  ;;  %394 = vmatprep.subr.mxu1 %v445_v1  ;;  %v40_v11 = vld [vmem:[%s631_s2 + $0x48] sm:$0xff]  ;;  %v128_v12 = vld [vmem:[%s633_s4 + $0x18] sm:$0xff]  ;;  %v39_v13 = vld [vmem:[%s631_s2 + $0x40] sm:$0xff]  ;;  %vm303_vm3 = vcmask 64512  }
   0xa   :  { %364 = vmatpush3.msra.mxu0 %v42_v7  ;;  %395 = vmatpush3.msra.mxu1 %v130_v8  ;;  %v38_v14 = vld [vmem:[%s631_s2 + $0x38] sm:$0xff]  ;;  %v37_v15 = vld [vmem:[%s631_s2 + $0x30] sm:$0xff]  ;;  %v36_v16 = vld [vmem:[%s631_s2 + $0x28] sm:$0xff] }
   0xb   :  { %365 = vmatprep.subr.mxu0 %v445_v1  ;;  %396 = vmatprep.subr.mxu1 %v445_v1  ;;  %v35_v17 = vld [vmem:[%s631_s2 + $0x20] sm:$0xff]  ;;  %v34_v18 = vld [vmem:[%s631_s2 + $0x18] sm:$0xff]  ;;  %v33_v19 = vld [vmem:[%s631_s2 + $0x10] sm:$0xff] }
   0xc   :  { %366 = vmatpush3.msra.mxu0 %v41_v9  ;;  %397 = vmatpush3.msra.mxu1 %v129_v10  ;;  %v32_v20 = vld [vmem:[%s631_s2 + $0x8] sm:$0xff]  ;;  %v31_v21 = vld [vmem:[%s631_s2] sm:$0xff]  ;;  %v127_v23 = vld [vmem:[%s633_s4 + $0x10] sm:$0xff] }
   0xd   :  { %367 = vmatprep.subr.mxu0 %v445_v1  ;;  %398 = vmatprep.subr.mxu1 %v445_v1  ;;  %v30_v22 = vld [vmem:[%s630_s1] sm:$0xff]  ;;  %v126_v24 = vld [vmem:[%s633_s4 + $0x8] sm:$0xff]  ;;  %v218_v31 = vld [vmem:[%s635_s6 + $0x18] sm:$0xff] }
   0xe   :  { %368 = vmatpush3.msra.mxu0 %v40_v11  ;;  %399 = vmatpush3.msra.mxu1 %v128_v12  ;;  %v125_v25 = vld [vmem:[%s633_s4] sm:$0xff]  ;;  %v217_v32 = vld [vmem:[%s635_s6 + $0x10] sm:$0xff]  ;;  %v216_v33 = vld [vmem:[%s635_s6 + $0x8] sm:$0xff] }
   0xf   :  { %369 = vmatprep.subr.mxu0 %v445_v1  ;;  %400 = vmatprep.subr.mxu1 %v445_v1  ;;  %v319_v26 = vld [vmem:[%s632_s3] ss:$0 sm:$0xff] }
  0x10   :  { %370 = vmatpush3.msra.mxu0 %v39_v13  ;;  %401 = vmatpush3.msra.mxu1 %v127_v23  ;;  %v215_v34 = vld [vmem:[%s635_s6] sm:$0xff]  ;;  %s447_s6 = smov [#allocation2]  }
  0x11   :  { %371 = vmatprep.subr.mxu0 %v445_v1  ;;  %402 = vmatprep.subr.mxu1 %v445_v1  ;;  %v320_v35 = vld [vmem:[%s634_s5] ss:$0 sm:$0xff]  ;;  %s311_s23 = sshll.u32 %s447_s6, 4  ;;  %s312_s23 = int_to_ptr.vmem [resolvable:$true] %s311_s23 }
  0x12   :  { %372 = vmatpush3.msra.mxu0 %v38_v14  ;;  %403 = vmatpush3.msra.mxu1 %v126_v24  ;;  %v322_v40 = vld [vmem:[%s636_s7] ss:$0 sm:$0xff]  ;;  %s423_s5 = scalar_lea.vmem %s312_s23, 128  ;;  %p428_p1 = scmp.lt.s32.totalorder %s312_s23, %s312_s23 }
  0x13   :  { %373 = vmatprep.subr.mxu0 %v445_v1  ;;  %404 = vmatprep.subr.mxu1 %v445_v1  ;;  %v301_v43 = vld [vmem:[%s629_s0] sm:$0xff]  ;;  %p424_p0 = scmp.ne.s32.totalorder %s312_s23, %s423_s5  ;;  %p429_p2 = scmp.lt.s32.totalorder %s423_s5, %s423_s5 }
  0x14   :  { %374 = vmatpush3.msra.mxu0 %v37_v15  ;;  %405 = vmatpush3.msra.mxu1 %v125_v25 }
  0x15   :  { %375 = vmatprep.subr.mxu0 %v445_v1  ;;  %409 = vmatprep.subr.mxu1 %v445_v1  ;;  %p430_p3 = por %p429_p2, %p428_p1 }
  0x16   :  { %376 = vmatpush3.msra.mxu0 %v36_v16 }
  0x17   :  { %377 = vmatprep.subr.mxu0 %v445_v1  ;;  %p431_p4 = pnand %p430_p3, %p424_p0 }
  0x18   :  { %378 = vmatpush3.msra.mxu0 %v35_v17 }
  0x19   :  { %379 = vmatprep.subr.mxu0 %v445_v1 }
  0x1a   :  { %380 = vmatpush3.msra.mxu0 %v34_v18 }
  0x1b   :  { %381 = vmatprep.subr.mxu0 %v445_v1 }
  0x1c   :  { %382 = vmatpush3.msra.mxu0 %v33_v19 }
  0x1d   :  { %383 = vmatprep.subr.mxu0 %v445_v1 }
  0x1e   :  { %384 = vmatpush3.msra.mxu0 %v32_v20 }
  0x1f   :  { %385 = vmatprep.subr.mxu0 %v445_v1 }
  0x20   :  { %386 = vmatpush3.msra.mxu0 %v31_v21 }
  0x21   :  { %388 = vmatmul.mubr.f32.vlgmr.msra.gmra.mxu0 %v30_v22 }
  0xe1   :  { %v120_v27 = vpop.f32.mrf.mxu0 }
  0xe2   :  { %v121_v28 = vadd.f32 %v319_v26, %v120_v27 }
  0xe3   :  { %v389_v29 = vpop.f32.mrf.mxu0 }
  0xe4   :  { %v124_v30 = vmax.f32 %v121_v28, 0.0 }
  0xe6   :  { %407 = vmatmul.mubr.msk.f32.vlgmr.msra.gmra.mxu1 %vm140_vm1, %v124_v30 }
  0xe7   :  { %410 = vmatpush3.msra.mxu1 %v218_v31  ;;  %417 = vmatprep.mubr.msk.f32.mxu1 %vm446_vm0, %v445_v1 }
  0xe8   :  { %411 = vmatprep.subr.mxu1 %v445_v1 }
  0xe9   :  { %412 = vmatpush3.msra.mxu1 %v217_v32 }
  0xea   :  { %413 = vmatprep.subr.mxu1 %v445_v1 }
  0xeb   :  { %414 = vmatpush3.msra.mxu1 %v216_v33 }
  0xec   :  { %415 = vmatprep.subr.mxu1 %v445_v1 }
  0xed   :  { %416 = vmatpush3.msra.mxu1 %v215_v34 }
 0x1a6   :  { %v210_v36 = vpop.f32.mrf.mxu1 }
 0x1a7   :  { %v211_v37 = vadd.f32 %v320_v35, %v210_v36 }
 0x1a8   :  { %v408_v38 = vpop.f32.mrf.mxu1 }
 0x1a9   :  { %v214_v39 = vmax.f32 %v211_v37, 0.0 }
 0x1ab   :  { %418 = vmatmul.mubr.msk.f32.vlgmr.msra.gmra.mxu1 %vm226_vm2, %v214_v39 }
 0x26b   :  { %v296_v41 = vpop.f32.mrf.mxu1 }
 0x26c   :  { %v297_v42 = vadd.f32 %v322_v40, %v296_v41 }
 0x26d   :  { %v419_v44 = vpop.f32.mrf.mxu1 }
 0x26e   :  { %v300_v45 = vmax.f32 %v297_v42, 0.0 }
 0x270   :  { %v302_v46 = vadd.f32 %v301_v43, %v300_v45 }
 0x272   :  { %304 = vst.msk [vmem:[#allocation2] sm:$0xff] %vm303_vm3, %v302_v46 }
 0x273   :  { %434 = shalt.err (!%p431_p4)
}
 0x274   :  { %314 = dma.vmem_to_hbm [thread:$0]  %s312_s23, 128, %s637_s8, [#allocation3]  }
 0x275   :  { %443 = dma.done.wait [#allocation3], 128  }
 0x276   :  { %444 = vsyncadd [#allocation3], 4294967168 }
 0x277   :  { %318 = vsyncpa [#allocation3], 1 }

</bundles_post_ra>
